<compile_context>
chip_gen: v7x
topology: tpu7x:2x2x1
jax: 0.10.0
libtpu: 0.0.40
codegen_flags: <defaults>
</compile_context>

<pallas_src>
import functools

import jax
import jax.numpy as jnp
from jax.experimental import pallas as pl
from jax.experimental.pallas import tpu as pltpu

_RP = 128  # LoRA rank padded to a full lane width.


def _round_up(x, m):
    return ((x + m - 1) // m) * m


def _cdiv(a, b):
    return -(-a // b)


def _pad2d(a, rows, cols):
    r, c = a.shape
    if r == rows and c == cols:
        return a
    return jnp.pad(a, ((0, rows - r), (0, cols - c)))


def _num_tensorcores():
    """2 on v7x (two TensorCores per chip), 1 on v5e/v6e; 1 if unknown."""
    try:
        kind = jax.devices()[0].device_kind.lower()
    except Exception:
        return 1
    return 2 if ("v7" in kind or "tpu7" in kind) else 1


def _vmem_budget_bytes():
    """~75% of physical VMEM per TensorCore; conservative 48 MiB fallback."""
    try:
        info = pltpu.get_tpu_info()
        cap = getattr(info, "vmem_capacity_bytes", None)
        if cap:
            return int(cap) * 3 // 4
    except Exception:
        pass
    return 48 * 1024 * 1024


def _vmem_footprint(tm, Dp, th, tdn, isz, osz, wbuf):
    """Estimated VMEM working set (bytes) for one grid step."""
    b = 0
    b += 2 * tm * Dp * isz                                 # x tile (2 buffers)
    b += wbuf * Dp * th * isz                              # W_up tile
    b += wbuf * th * tdn * isz                             # W_down tile
    b += 2 * (Dp * _RP + _RP * th + th * _RP + _RP * tdn) * isz  # LoRA factors
    b += 2 * (th + tdn) * 4                                # biases (fp32)
    b += 2 * tm * tdn * osz                                # output tile
    b += tm * tdn * 4 + 2 * tm * _RP * 4                   # acc + xa + lacc
    return b


def _choose_config(M, D, H, isz, osz, tm_req, th_req, min_dout_tiles, budget):
    Dp = _round_up(D, 128)

    # Balanced row tiling: the last tile is never mostly padding.
    tm_cap = max(8, min(tm_req, _round_up(M, 8)))
    n_m = _cdiv(M, tm_cap)
    tm = _round_up(_cdiv(M, n_m), 8)
    Mp = tm * n_m

    # Output-D split: keep both v7x TensorCores busy when there is only a
    # single row tile (decode-sized M); otherwise keep D un-tiled so weights
    # stream exactly once per row tile.
    n_dout = 1
    want = max(1, min_dout_tiles)
    if n_m == 1 and _num_tensorcores() >= 2:
        want = max(want, 2)
    while want > 1:
        if Dp % (128 * want) == 0:
            n_dout = want
            break
        want -= 1
    tdn = Dp // n_dout

    # Balanced H tiling, shrunk until the double-buffered working set fits.
    Hp128 = _round_up(H, 128)
    n_h = _cdiv(Hp128, max(128, min(th_req, Hp128)))
    while True:
        th = _round_up(_cdiv(Hp128, n_h), 128)
        if _vmem_footprint(tm, Dp, th, tdn, isz, osz, 2) <= budget or th == 128:
            break
        n_h += 1
    # If a single 128-wide H tile still does not fit, shrink the row tile.
    while _vmem_footprint(tm, Dp, th, tdn, isz, osz, 2) > budget and tm > 8:
        tm = _round_up(max(8, tm // 2), 8)
        n_m = _cdiv(M, tm)
        tm = _round_up(_cdiv(M, n_m), 8)
        Mp = tm * n_m
    Hp = th * n_h
    n_h = Hp // th

    # Triple-buffer the streamed weight tiles when there is headroom.
    wbuf = 3 if (n_h >= 3 and
                 _vmem_footprint(tm, Dp, th, tdn, isz, osz, 3) <= budget) else 2
    return tm, Mp, th, Hp, n_h, Dp, tdn, n_dout, wbuf


def _weight_spec(shape, index_map, buffers):
    if buffers > 2:
        try:
            return pl.BlockSpec(shape, index_map, pipeline_mode=pl.Buffered(buffers))
        except Exception:
            pass  # fall back to default double-buffering
    return pl.BlockSpec(shape, index_map)


def _mlp_kernel(x_ref, wup_ref, bup_ref, aup_ref, bupl_ref,
                wdn_ref, bdn_ref, adn_ref, bdnl_ref,
                out_ref, acc_ref, xa_ref, lacc_ref, *, activation):
    h = pl.program_id(2)
    nh = pl.num_programs(2)

    @pl.when(h == 0)
    def _():
        # x @ A_up (rank-R, padded to 128 lanes): once per (row, d-out) tile.
        xa_ref[...] = jnp.dot(x_ref[...], aup_ref[...],
                              preferred_element_type=jnp.float32)

    # ---- Up projection (+ LoRA) for this H tile, fp32 accumulate ----------
    y1 = jnp.dot(x_ref[...], wup_ref[...], preferred_element_type=jnp.float32)
    y1 = y1 + jnp.dot(xa_ref[...].astype(bupl_ref.dtype), bupl_ref[...],
                      preferred_element_type=jnp.float32)
    y1 = y1 + bup_ref[...]                        # (1, th) broadcasts over rows

    # ---- Activation in fp32 (EUP-backed forms preferred) ------------------
    if activation == "relu":
        x2 = jnp.maximum(y1, 0.0)
    elif activation == "silu":
        x2 = y1 * jax.nn.sigmoid(y1)
    elif activation == "gelu":
        # tanh-approx gelu -> EUP slot (effectively free under an MXU/DMA-
        # bound loop; exact erf would burn VALU cycles, esp. on v5e).
        x2 = jax.nn.gelu(y1, approximate=True)
    else:
        raise ValueError(f"unknown activation {activation!r}")
    x2 = x2.astype(wdn_ref.dtype)

    # ---- Down projection partial sums over this H tile --------------------
    down_part = jnp.dot(x2, wdn_ref[...], preferred_element_type=jnp.float32)
    lora_part = jnp.dot(x2, adn_ref[...], preferred_element_type=jnp.float32)

    @pl.when(h == 0)
    def _():
        acc_ref[...] = down_part                  # no zero-init sweep
        lacc_ref[...] = lora_part

    @pl.when(h > 0)
    def _():
        acc_ref[...] += down_part
        lacc_ref[...] += lora_part

    @pl.when(h == nh - 1)
    def _():
        y2 = acc_ref[...] + bdn_ref[...]
        y2 = y2 + jnp.dot(lacc_ref[...].astype(bdnl_ref.dtype), bdnl_ref[...],
                          preferred_element_type=jnp.float32)
        out_ref[...] = y2.astype(out_ref.dtype)


def mixed_sparse_traditional_mlp(x, w_up, b_up, a_up, b_up_lora,
                                 w_down, b_down, a_down, b_down_lora,
                                 *, activation="relu", tm=512, th=512,
                                 compute_dtype=jnp.bfloat16,
                                 min_dout_tiles=1):
    """Fused MLP forward.

    x: (B, S, D). w_up: (D, H), b_up: (H,) or None, a_up: (D, R),
    b_up_lora: (R, H), w_down: (H, D), b_down: (D,) or None, a_down: (H, R),
    b_down_lora: (R, D).

    Streamed operands are cast to `compute_dtype` (bf16 by default; the cast
    is a no-op if the caller already holds bf16 params); accumulation is fp32.
    """
    if activation not in ("relu", "silu", "gelu"):
        raise ValueError(f"unknown activation {activation!r}")

    B, S, D = x.shape
    H = w_up.shape[1]
    M = B * S
    out_dtype = x.dtype

    if b_up is None:
        b_up = jnp.zeros((H,), jnp.float32)
    if b_down is None:
        b_down = jnp.zeros((D,), jnp.float32)

    isz = jnp.dtype(compute_dtype).itemsize
    osz = jnp.dtype(out_dtype).itemsize
    budget = _vmem_budget_bytes()

    (tm_eff, Mp, th_eff, Hp, n_h, Dp, tdn, n_dout, wbuf) = _choose_config(
        M, D, H, isz, osz, tm, th, min_dout_tiles, budget)
    n_m = Mp // tm_eff
    cd = compute_dtype

    # Cast + pad to lane/sublane-friendly shapes.  LoRA factors are NOT folded
    # into the base weights (no full-size fp32 temporaries per call); the
    # rank-R correction is applied inside the kernel.
    x2d = _pad2d(x.reshape(M, D).astype(cd), Mp, Dp)
    wup_p = _pad2d(w_up.astype(cd), Dp, Hp)
    wdn_p = _pad2d(w_down.astype(cd), Hp, Dp)
    aup_p = _pad2d(a_up.astype(cd), Dp, _RP)
    bupl_p = _pad2d(b_up_lora.astype(cd), _RP, Hp)
    adn_p = _pad2d(a_down.astype(cd), Hp, _RP)
    bdnl_p = _pad2d(b_down_lora.astype(cd), _RP, Dp)
    bup_p = _pad2d(b_up.reshape(1, H).astype(jnp.float32), 1, Hp)
    bdn_p = _pad2d(b_down.reshape(1, D).astype(jnp.float32), 1, Dp)

    grid = (n_m, n_dout, n_h)

    # Honest cost estimate: weights are re-streamed once per row tile (and
    # W_up once more per output-D tile).
    flops = 2 * Mp * Dp * Hp * (n_dout + 1) + 4 * Mp * _RP * (Dp + Hp)
    transcendentals = 0 if activation == "relu" else Mp * Hp * n_dout
    bytes_accessed = (Mp * Dp * isz
                      + n_m * n_dout * Dp * Hp * isz
                      + n_m * Hp * Dp * isz
                      + Mp * Dp * osz
                      + (Dp * _RP + _RP * Hp + Hp * _RP + _RP * Dp) * isz
                      + (Hp + Dp) * 4)
    cost = pl.CostEstimate(flops=int(flops), transcendentals=int(transcendentals),
                           bytes_accessed=int(bytes_accessed))

    in_specs = [
        pl.BlockSpec((tm_eff, Dp), lambda i, j, h: (i, 0)),      # x row tile
        _weight_spec((Dp, th_eff), lambda i, j, h: (0, h), wbuf),  # W_up
        pl.BlockSpec((1, th_eff), lambda i, j, h: (0, h)),       # b_up
        pl.BlockSpec((Dp, _RP), lambda i, j, h: (0, 0)),         # A_up (resident)
        pl.BlockSpec((_RP, th_eff), lambda i, j, h: (0, h)),     # B_up (lora)
        _weight_spec((th_eff, tdn), lambda i, j, h: (h, j), wbuf),  # W_down
        pl.BlockSpec((1, tdn), lambda i, j, h: (0, j)),          # b_down
        pl.BlockSpec((th_eff, _RP), lambda i, j, h: (h, 0)),     # A_down
        pl.BlockSpec((_RP, tdn), lambda i, j, h: (0, j)),        # B_down (lora)
    ]
    out_specs = pl.BlockSpec((tm_eff, tdn), lambda i, j, h: (i, j))
    scratch_shapes = [
        pltpu.VMEM((tm_eff, tdn), jnp.float32),   # down-proj accumulator
        pltpu.VMEM((tm_eff, _RP), jnp.float32),   # x @ A_up
        pltpu.VMEM((tm_eff, _RP), jnp.float32),   # x2 @ A_down accumulator
    ]

    out2d = pl.pallas_call(
        functools.partial(_mlp_kernel, activation=activation),
        out_shape=jax.ShapeDtypeStruct((Mp, Dp), out_dtype),
        grid_spec=pltpu.PrefetchScalarGridSpec(
            num_scalar_prefetch=0,
            grid=grid,
            in_specs=in_specs,
            out_specs=out_specs,
            scratch_shapes=scratch_shapes),
        compiler_params=pltpu.CompilerParams(
            dimension_semantics=("parallel", "parallel", "arbitrary"),
            vmem_limit_bytes=int(budget)),
        cost_estimate=cost,
    )(x2d, wup_p, bup_p, aup_p, bupl_p, wdn_p, bdn_p, adn_p, bdnl_p)

    return out2d[:M, :D].reshape(B, S, D)


def _reference(x, w_up, b_up, a_up, b_up_lora, w_down, b_down, a_down,
               b_down_lora, activation="relu"):
    y1 = x @ w_up + b_up + (x @ a_up) @ b_up_lora
    if activation == "relu":
        x2 = jnp.maximum(y1, 0.0)
    elif activation == "silu":
        x2 = y1 * jax.nn.sigmoid(y1)
    else:
        x2 = jax.nn.gelu(y1, approximate=True)
    return x2 @ w_down + b_down + (x2 @ a_down) @ b_down_lora


def _make_inputs(key, B, S, D, H, R):
    keys = jax.random.split(key, 9)
    x = jax.random.normal(keys[0], (B, S, D), dtype=jnp.float32)
    # "Dequantized" base weights are dense params here (no bnb 4-bit storage).
    w_up = jax.random.normal(keys[1], (D, H), dtype=jnp.float32) * (1.0 / D ** 0.5)
    b_up = jax.random.normal(keys[2], (H,), dtype=jnp.float32) * 0.1
    a_up = jax.random.normal(keys[3], (D, R), dtype=jnp.float32) * (1.0 / D ** 0.5)
    b_up_lora = jax.random.normal(keys[4], (R, H), dtype=jnp.float32) * (1.0 / R ** 0.5)
    w_down = jax.random.normal(keys[5], (H, D), dtype=jnp.float32) * (1.0 / H ** 0.5)
    b_down = jax.random.normal(keys[6], (D,), dtype=jnp.float32) * 0.1
    a_down = jax.random.normal(keys[7], (H, R), dtype=jnp.float32) * (1.0 / H ** 0.5)
    b_down_lora = jax.random.normal(keys[8], (R, D), dtype=jnp.float32) * (1.0 / R ** 0.5)
    return (x, w_up, b_up, a_up, b_up_lora, w_down, b_down, a_down, b_down_lora)


if __name__ == "__main__":
    key = jax.random.PRNGKey(0)
    k1, k2 = jax.random.split(key)

    # --- Test 1/2: small shapes, default bf16 path and fp32 path -----------
    B, S, D, H, R = 2, 8, 32, 64, 8
    args = _make_inputs(k1, B, S, D, H, R)
    ref = _reference(*args, activation="relu")

    y2_bf16 = mixed_sparse_traditional_mlp(*args, activation="relu")
    y2_bf16 = jax.block_until_ready(y2_bf16)
    assert y2_bf16.shape == (B, S, D)
    assert jnp.allclose(y2_bf16, ref, atol=5e-2, rtol=5e-2)

    y2_f32 = mixed_sparse_traditional_mlp(*args, activation="relu",
                                          compute_dtype=jnp.float32)
    y2_f32 = jax.block_until_ready(y2_f32)
    assert jnp.allclose(y2_f32, ref, atol=2e-4, rtol=2e-4)

    # --- Test 3: multi-H-tile accumulation + output-D split (v7x decode
    # path) + triple-buffered weight streams, exercised on any chip ---------
    B2, S2, D2, H2 = 2, 8, 256, 384
    args2 = _make_inputs(k2, B2, S2, D2, H2, R)
    ref2 = _reference(*args2, activation="silu")
    y2b = mixed_sparse_traditional_mlp(*args2, activation="silu", th=128,
                                       min_dout_tiles=2,
                                       compute_dtype=jnp.float32)
    y2b = jax.block_until_ready(y2b)
    assert y2b.shape == (B2, S2, D2)
    assert jnp.allclose(y2b, ref2, atol=5e-4, rtol=5e-4)

    # TODO(synk): nf4 weight/activation (de)quantization and the top-k channel
    # sparsification only feed the backward ctx in the reference and are
    # omitted from the forward kernel (caller passes dense dequantized weights).
    print("KERNEL_OK")
</pallas_src>

<mosaic_0001>
module attributes {stable_mosaic.version = 11 : i64} {
  func.func @_mlp_kernel(%arg0: i32, %arg1: i32, %arg2: i32, %arg3: memref<16x128xbf16, #tpu.memory_space<vmem>>, %arg4: memref<128x128xbf16, #tpu.memory_space<vmem>>, %arg5: memref<1x128xf32, #tpu.memory_space<vmem>>, %arg6: memref<128x128xbf16, #tpu.memory_space<vmem>>, %arg7: memref<128x128xbf16, #tpu.memory_space<vmem>>, %arg8: memref<128x128xbf16, #tpu.memory_space<vmem>>, %arg9: memref<1x128xf32, #tpu.memory_space<vmem>>, %arg10: memref<128x128xbf16, #tpu.memory_space<vmem>>, %arg11: memref<128x128xbf16, #tpu.memory_space<vmem>>, %arg12: memref<16x128xf32, #tpu.memory_space<vmem>>, %arg13: memref<16x128xf32, #tpu.memory_space<vmem>>, %arg14: memref<16x128xf32, #tpu.memory_space<vmem>>, %arg15: memref<16x128xf32, #tpu.memory_space<vmem>>) attributes {dimension_semantics = [#tpu.dimension_semantics<parallel>, #tpu.dimension_semantics<parallel>, #tpu.dimension_semantics<arbitrary>], iteration_bounds = array<i64: 1, 1, 1>, scalar_prefetch = 0 : i64, scratch_operands = 3 : i64, tpu.core_type = #tpu.core_type<tc>, window_params = [{transform_indices = @transform_0, window_bounds = array<i64: 16, 128>}, {transform_indices = @transform_1, window_bounds = array<i64: 128, 128>}, {transform_indices = @transform_2, window_bounds = array<i64: 1, 128>}, {pipeline_mode = #tpu.pipeline_mode<synchronous>, transform_indices = @transform_3, window_bounds = array<i64: 128, 128>}, {transform_indices = @transform_4, window_bounds = array<i64: 128, 128>}, {transform_indices = @transform_5, window_bounds = array<i64: 128, 128>}, {transform_indices = @transform_6, window_bounds = array<i64: 1, 128>}, {transform_indices = @transform_7, window_bounds = array<i64: 128, 128>}, {transform_indices = @transform_8, window_bounds = array<i64: 128, 128>}, {transform_indices = @transform_9, window_bounds = array<i64: 16, 128>}]} {
    %c0_i32 = arith.constant 0 : i32
    %0 = arith.cmpi eq, %arg2, %c0_i32 : i32
    %1 = arith.extui %0 : i1 to i32
    %c0_i32_0 = arith.constant 0 : i32
    %2 = arith.cmpi ne, %1, %c0_i32_0 : i32
    scf.if %2 {
      %c0_24 = arith.constant 0 : index
      %c0_25 = arith.constant 0 : index
      %30 = vector.load %arg3[%c0_24, %c0_25] : memref<16x128xbf16, #tpu.memory_space<vmem>>, vector<16x128xbf16>
      %c0_26 = arith.constant 0 : index
      %c0_27 = arith.constant 0 : index
      %31 = vector.load %arg6[%c0_26, %c0_27] : memref<128x128xbf16, #tpu.memory_space<vmem>>, vector<128x128xbf16>
      %cst_28 = arith.constant dense<0.000000e+00> : vector<16x128xf32>
      %32 = tpu.matmul %30, %31, %cst_28 {dimension_numbers = #tpu.dot_dimension_numbers<[1], [0], [0], [1], [0, 0, 1, 1], [], []>} : vector<16x128xbf16>, vector<128x128xbf16>, vector<16x128xf32> -> vector<16x128xf32>
      %c0_29 = arith.constant 0 : index
      %c0_30 = arith.constant 0 : index
      %33 = vector.load %arg14[%c0_29, %c0_30] : memref<16x128xf32, #tpu.memory_space<vmem>>, vector<16x128xf32>
      tpu.vector_store %arg14[%c0_29, %c0_30], %32 {strides = array<i32>} : memref<16x128xf32, #tpu.memory_space<vmem>>, vector<16x128xf32>,
    } else {
    }
    %c0 = arith.constant 0 : index
    %c0_1 = arith.constant 0 : index
    %3 = vector.load %arg3[%c0, %c0_1] : memref<16x128xbf16, #tpu.memory_space<vmem>>, vector<16x128xbf16>
    %c0_2 = arith.constant 0 : index
    %c0_3 = arith.constant 0 : index
    %4 = vector.load %arg4[%c0_2, %c0_3] : memref<128x128xbf16, #tpu.memory_space<vmem>>, vector<128x128xbf16>
    %cst = arith.constant dense<0.000000e+00> : vector<16x128xf32>
    %5 = tpu.matmul %3, %4, %cst {dimension_numbers = #tpu.dot_dimension_numbers<[1], [0], [0], [1], [0, 0, 1, 1], [], []>} : vector<16x128xbf16>, vector<128x128xbf16>, vector<16x128xf32> -> vector<16x128xf32>
    %c0_4 = arith.constant 0 : index
    %c0_5 = arith.constant 0 : index
    %6 = vector.load %arg14[%c0_4, %c0_5] : memref<16x128xf32, #tpu.memory_space<vmem>>, vector<16x128xf32>
    %7 = arith.truncf %6 : vector<16x128xf32> to vector<16x128xbf16>
    %c0_6 = arith.constant 0 : index
    %c0_7 = arith.constant 0 : index
    %8 = vector.load %arg7[%c0_6, %c0_7] : memref<128x128xbf16, #tpu.memory_space<vmem>>, vector<128x128xbf16>
    %cst_8 = arith.constant dense<0.000000e+00> : vector<16x128xf32>
    %9 = tpu.matmul %7, %8, %cst_8 {dimension_numbers = #tpu.dot_dimension_numbers<[1], [0], [0], [1], [0, 0, 1, 1], [], []>} : vector<16x128xbf16>, vector<128x128xbf16>, vector<16x128xf32> -> vector<16x128xf32>
    %10 = arith.addf %5, %9 : vector<16x128xf32>
    %c0_9 = arith.constant 0 : index
    %c0_10 = arith.constant 0 : index
    %11 = vector.load %arg5[%c0_9, %c0_10] : memref<1x128xf32, #tpu.memory_space<vmem>>, vector<1x128xf32>
    %12 = vector.broadcast %11 : vector<1x128xf32> to vector<16x128xf32>
    %13 = arith.addf %10, %12 : vector<16x128xf32>
    %cst_11 = arith.constant 0.000000e+00 : f32
    %14 = vector.broadcast %cst_11 : f32 to vector<16x128xf32>
    %15 = arith.maximumf %13, %14 : vector<16x128xf32>
    %16 = arith.truncf %15 : vector<16x128xf32> to vector<16x128xbf16>
    %c0_12 = arith.constant 0 : index
    %c0_13 = arith.constant 0 : index
    %17 = vector.load %arg8[%c0_12, %c0_13] : memref<128x128xbf16, #tpu.memory_space<vmem>>, vector<128x128xbf16>
    %cst_14 = arith.constant dense<0.000000e+00> : vector<16x128xf32>
    %18 = tpu.matmul %16, %17, %cst_14 {dimension_numbers = #tpu.dot_dimension_numbers<[1], [0], [0], [1], [0, 0, 1, 1], [], []>} : vector<16x128xbf16>, vector<128x128xbf16>, vector<16x128xf32> -> vector<16x128xf32>
    %c0_15 = arith.constant 0 : index
    %c0_16 = arith.constant 0 : index
    %19 = vector.load %arg10[%c0_15, %c0_16] : memref<128x128xbf16, #tpu.memory_space<vmem>>, vector<128x128xbf16>
    %cst_17 = arith.constant dense<0.000000e+00> : vector<16x128xf32>
    %20 = tpu.matmul %16, %19, %cst_17 {dimension_numbers = #tpu.dot_dimension_numbers<[1], [0], [0], [1], [0, 0, 1, 1], [], []>} : vector<16x128xbf16>, vector<128x128xbf16>, vector<16x128xf32> -> vector<16x128xf32>
    %c0_i32_18 = arith.constant 0 : i32
    %21 = arith.cmpi eq, %arg2, %c0_i32_18 : i32
    %22 = arith.extui %21 : i1 to i32
    %c0_i32_19 = arith.constant 0 : i32
    %23 = arith.cmpi ne, %22, %c0_i32_19 : i32
    scf.if %23 {
      %c0_24 = arith.constant 0 : index
      %c0_25 = arith.constant 0 : index
      %30 = vector.load %arg13[%c0_24, %c0_25] : memref<16x128xf32, #tpu.memory_space<vmem>>, vector<16x128xf32>
      tpu.vector_store %arg13[%c0_24, %c0_25], %18 {strides = array<i32>} : memref<16x128xf32, #tpu.memory_space<vmem>>, vector<16x128xf32>,
      %c0_26 = arith.constant 0 : index
      %c0_27 = arith.constant 0 : index
      %31 = vector.load %arg15[%c0_26, %c0_27] : memref<16x128xf32, #tpu.memory_space<vmem>>, vector<16x128xf32>
      tpu.vector_store %arg15[%c0_26, %c0_27], %20 {strides = array<i32>} : memref<16x128xf32, #tpu.memory_space<vmem>>, vector<16x128xf32>,
    } else {
    }
    %c0_i32_20 = arith.constant 0 : i32
    %24 = arith.cmpi sgt, %arg2, %c0_i32_20 : i32
    %25 = arith.extui %24 : i1 to i32
    %c0_i32_21 = arith.constant 0 : i32
    %26 = arith.cmpi ne, %25, %c0_i32_21 : i32
    scf.if %26 {
      %c0_24 = arith.constant 0 : index
      %c0_25 = arith.constant 0 : index
      %30 = vector.load %arg13[%c0_24, %c0_25] : memref<16x128xf32, #tpu.memory_space<vmem>>, vector<16x128xf32>
      %31 = arith.addf %30, %18 : vector<16x128xf32>
      %c0_26 = arith.constant 0 : index
      %c0_27 = arith.constant 0 : index
      %32 = vector.load %arg13[%c0_26, %c0_27] : memref<16x128xf32, #tpu.memory_space<vmem>>, vector<16x128xf32>
      tpu.vector_store %arg13[%c0_26, %c0_27], %31 {strides = array<i32>} : memref<16x128xf32, #tpu.memory_space<vmem>>, vector<16x128xf32>,
      %c0_28 = arith.constant 0 : index
      %c0_29 = arith.constant 0 : index
      %33 = vector.load %arg15[%c0_28, %c0_29] : memref<16x128xf32, #tpu.memory_space<vmem>>, vector<16x128xf32>
      %34 = arith.addf %33, %20 : vector<16x128xf32>
      %c0_30 = arith.constant 0 : index
      %c0_31 = arith.constant 0 : index
      %35 = vector.load %arg15[%c0_30, %c0_31] : memref<16x128xf32, #tpu.memory_space<vmem>>, vector<16x128xf32>
      tpu.vector_store %arg15[%c0_30, %c0_31], %34 {strides = array<i32>} : memref<16x128xf32, #tpu.memory_space<vmem>>, vector<16x128xf32>,
    } else {
    }
    %c0_i32_22 = arith.constant 0 : i32
    %27 = arith.cmpi eq, %arg2, %c0_i32_22 : i32
    %28 = arith.extui %27 : i1 to i32
    %c0_i32_23 = arith.constant 0 : i32
    %29 = arith.cmpi ne, %28, %c0_i32_23 : i32
    scf.if %29 {
      %c0_24 = arith.constant 0 : index
      %c0_25 = arith.constant 0 : index
      %30 = vector.load %arg13[%c0_24, %c0_25] : memref<16x128xf32, #tpu.memory_space<vmem>>, vector<16x128xf32>
      %c0_26 = arith.constant 0 : index
      %c0_27 = arith.constant 0 : index
      %31 = vector.load %arg9[%c0_26, %c0_27] : memref<1x128xf32, #tpu.memory_space<vmem>>, vector<1x128xf32>
      %32 = vector.broadcast %31 : vector<1x128xf32> to vector<16x128xf32>
      %33 = arith.addf %30, %32 : vector<16x128xf32>
      %c0_28 = arith.constant 0 : index
      %c0_29 = arith.constant 0 : index
      %34 = vector.load %arg15[%c0_28, %c0_29] : memref<16x128xf32, #tpu.memory_space<vmem>>, vector<16x128xf32>
      %35 = arith.truncf %34 : vector<16x128xf32> to vector<16x128xbf16>
      %c0_30 = arith.constant 0 : index
      %c0_31 = arith.constant 0 : index
      %36 = vector.load %arg11[%c0_30, %c0_31] : memref<128x128xbf16, #tpu.memory_space<vmem>>, vector<128x128xbf16>
      %cst_32 = arith.constant dense<0.000000e+00> : vector<16x128xf32>
      %37 = tpu.matmul %35, %36, %cst_32 {dimension_numbers = #tpu.dot_dimension_numbers<[1], [0], [0], [1], [0, 0, 1, 1], [], []>} : vector<16x128xbf16>, vector<128x128xbf16>, vector<16x128xf32> -> vector<16x128xf32>
      %38 = arith.addf %33, %37 : vector<16x128xf32>
      %c0_33 = arith.constant 0 : index
      %c0_34 = arith.constant 0 : index
      %39 = vector.load %arg12[%c0_33, %c0_34] : memref<16x128xf32, #tpu.memory_space<vmem>>, vector<16x128xf32>
      tpu.vector_store %arg12[%c0_33, %c0_34], %38 {strides = array<i32>} : memref<16x128xf32, #tpu.memory_space<vmem>>, vector<16x128xf32>,
    } else {
    }
    return
  }
  func.func @transform_0(%arg0: i32, %arg1: i32, %arg2: i32) -> (i32, i32) {
    %c0_i32 = arith.constant 0 : i32
    %c0_i32_0 = arith.constant 0 : i32
    return %arg0, %c0_i32 : i32, i32
  }
  func.func @transform_1(%arg0: i32, %arg1: i32, %arg2: i32) -> (i32, i32) {
    %c0_i32 = arith.constant 0 : i32
    %c0_i32_0 = arith.constant 0 : i32
    return %c0_i32, %arg2 : i32, i32
  }
  func.func @transform_2(%arg0: i32, %arg1: i32, %arg2: i32) -> (i32, i32) {
    %c0_i32 = arith.constant 0 : i32
    %c0_i32_0 = arith.constant 0 : i32
    return %c0_i32, %arg2 : i32, i32
  }
  func.func @transform_3(%arg0: i32, %arg1: i32, %arg2: i32) -> (i32, i32) {
    %c0_i32 = arith.constant 0 : i32
    %c0_i32_0 = arith.constant 0 : i32
    %c0_i32_1 = arith.constant 0 : i32
    return %c0_i32, %c0_i32_0 : i32, i32
  }
  func.func @transform_4(%arg0: i32, %arg1: i32, %arg2: i32) -> (i32, i32) {
    %c0_i32 = arith.constant 0 : i32
    %c0_i32_0 = arith.constant 0 : i32
    return %c0_i32, %arg2 : i32, i32
  }
  func.func @transform_5(%arg0: i32, %arg1: i32, %arg2: i32) -> (i32, i32) {
    %c0_i32 = arith.constant 0 : i32
    return %arg2, %arg1 : i32, i32
  }
  func.func @transform_6(%arg0: i32, %arg1: i32, %arg2: i32) -> (i32, i32) {
    %c0_i32 = arith.constant 0 : i32
    %c0_i32_0 = arith.constant 0 : i32
    return %c0_i32, %arg1 : i32, i32
  }
  func.func @transform_7(%arg0: i32, %arg1: i32, %arg2: i32) -> (i32, i32) {
    %c0_i32 = arith.constant 0 : i32
    %c0_i32_0 = arith.constant 0 : i32
    return %arg2, %c0_i32 : i32, i32
  }
  func.func @transform_8(%arg0: i32, %arg1: i32, %arg2: i32) -> (i32, i32) {
    %c0_i32 = arith.constant 0 : i32
    %c0_i32_0 = arith.constant 0 : i32
    return %c0_i32, %arg1 : i32, i32
  }
  func.func @transform_9(%arg0: i32, %arg1: i32, %arg2: i32) -> (i32, i32) {
    %c0_i32 = arith.constant 0 : i32
    return %arg0, %arg1 : i32, i32
  }
}

</mosaic_0001>

<bundles_post_ra>
// kernel: tpu_custom_call.1
= control target key start
LH: loop header
LB: loop body
LE: loop exit
PB: predicated region body
PF: predicated region fallthrough
CT: control target
= control target key end

     0   :  { %14 = vsyncpa [#allocation6], 0  ;;  %s1610_s0 = inlined_call_operand.hbm [shape: bf16[16,128], index: 0, kind: input, shape index: {}]   ;;  %s1611_s1 = inlined_call_operand.hbm [shape: bf16[128,128], index: 1, kind: input, shape index: {}]   ;;  %s1612_s2 = inlined_call_operand.vmem [shape: f32[1,128], index: 2, kind: input, shape index: {}]   ;;  %s1613_s3 = inlined_call_operand.hbm [shape: bf16[128,128], index: 3, kind: input, shape index: {}]   ;;  %s1614_s4 = inlined_call_operand.hbm [shape: bf16[128,128], index: 4, kind: input, shape index: {}]   ;;  %s1615_s5 = inlined_call_operand.hbm [shape: bf16[128,128], index: 5, kind: input, shape index: {}]   ;;  %s1616_s6 = inlined_call_operand.vmem [shape: f32[1,128], index: 6, kind: input, shape index: {}]   ;;  %s1617_s7 = inlined_call_operand.hbm [shape: bf16[128,128], index: 7, kind: input, shape index: {}]   ;;  %s1618_s8 = inlined_call_operand.hbm [shape: bf16[128,128], index: 8, kind: input, shape index: {}]   ;;  %s1619_s9 = inlined_call_operand.hbm [shape: f32[16,128], index: 9, kind: output, shape index: {}]  }
   0x1   :  { %15 = vsyncpa [#allocation9], 0 }
   0x2   :  { %16 = vsyncpa [#allocation12], 0 }
   0x3   :  { %17 = vsyncpa [#allocation15], 0 }
   0x4   :  { %18 = vsyncpa [#allocation7], 0  ;;  %s1342_s30 = smov [#allocation8]   ;;  %s1343_s11 = smov [#allocation11]  }
   0x5   :  { %s36_s10 = sshll.u32 %s1342_s30, 4  ;;  %s62_s12 = sshll.u32 %s1343_s11, 4  ;;  %s37_s10 = int_to_ptr.vmem [resolvable:$true] %s36_s10  ;;  %s1406_s12 = int_to_ptr.vmem [resolvable:$true] %s62_s12 }
   0x6   :  { %s1156_s15 = scalar_lea.hbm %s1611_s1, 1024 }
   0x7   :  { %p1157_p0 = scmp.ne.s32.totalorder %s1611_s1, %s1156_s15  ;;  %p1160_p1 = scmp.lt.u32.totalorder %s1156_s15, %s1611_s1 }
   0x9   :  { %p1162_p2 = pnand %p1160_p1, %p1157_p0 }
   0xb   :  { %1165 = shalt.err (!%p1162_p2)
}
   0xc   :  { %s1166_s20 = scalar_lea.vmem %s37_s10, 1024  ;;  %p1171_p4 = scmp.lt.s32.totalorder %s37_s10, %s37_s10 }
   0xd   :  { %p1167_p3 = scmp.ne.s32.totalorder %s37_s10, %s1166_s20  ;;  %p1172_p5 = scmp.lt.s32.totalorder %s1166_s20, %s1166_s20 }
   0xf   :  { %p1173_p6 = por %p1172_p5, %p1171_p4 }
  0x11   :  { %p1174_p7 = pnand %p1173_p6, %p1167_p3 }
  0x13   :  { %1177 = shalt.err (!%p1174_p7)
}
  0x14   :  { %s1344_s21 = smov 64   ;;  %s1345_s22 = smov 4  }
  0x15   :  { %42 = dma.hbm_to_vmem [thread:$0]  %s1611_s1, 1024, %s37_s10, [#allocation9], %s1344_s21, %s1344_s21, %s1345_s22  }
  0x16   :  { %s1178_s27 = scalar_lea.hbm %s1614_s4, 1024 }
  0x17   :  { %p1179_p8 = scmp.ne.s32.totalorder %s1614_s4, %s1178_s27  ;;  %p1182_p9 = scmp.lt.u32.totalorder %s1178_s27, %s1614_s4 }
  0x19   :  { %p1184_p10 = pnand %p1182_p9, %p1179_p8 }
  0x1b   :  { %1187 = shalt.err (!%p1184_p10)
}
  0x1c   :  { %s1188_s13 = scalar_lea.vmem %s1406_s12, 1024  ;;  %p1193_p12 = scmp.lt.s32.totalorder %s1406_s12, %s1406_s12 }
  0x1d   :  { %p1189_p11 = scmp.ne.s32.totalorder %s1406_s12, %s1188_s13  ;;  %p1194_p13 = scmp.lt.s32.totalorder %s1188_s13, %s1188_s13 }
  0x1f   :  { %p1195_p0 = por %p1194_p13, %p1193_p12 }
  0x21   :  { %p1196_p1 = pnand %p1195_p0, %p1189_p11 }
  0x23   :  { %1199 = shalt.err (!%p1196_p1)
}
  0x24   :  { %68 = dma.hbm_to_vmem [thread:$0]  %s1614_s4, 1024, %s1406_s12, [#allocation12], %s1344_s21, %s1344_s21, %s1345_s22  }
  0x25   :  { %s1346_s14 = smov [#allocation14]   ;;  %s1347_s16 = smov [#allocation5]  }
  0x26   :  { %s88_s15 = sshll.u32 %s1346_s14, 4  ;;  %s24_s17 = sshll.u32 %s1347_s16, 4  ;;  %s89_s15 = int_to_ptr.vmem [resolvable:$true] %s88_s15  ;;  %s1443_s17 = int_to_ptr.vmem [resolvable:$true] %s24_s17 }
  0x27   :  { %s1200_s20 = scalar_lea.hbm %s1617_s7, 1024 }
  0x28   :  { %p1201_p2 = scmp.ne.s32.totalorder %s1617_s7, %s1200_s20  ;;  %p1204_p3 = scmp.lt.u32.totalorder %s1200_s20, %s1617_s7 }
  0x2a   :  { %p1206_p4 = pnand %p1204_p3, %p1201_p2 }
  0x2c   :  { %1209 = shalt.err (!%p1206_p4)
}
  0x2d   :  { %s1210_s4 = scalar_lea.vmem %s89_s15, 1024  ;;  %p1215_p6 = scmp.lt.s32.totalorder %s89_s15, %s89_s15 }
  0x2e   :  { %p1211_p5 = scmp.ne.s32.totalorder %s89_s15, %s1210_s4  ;;  %p1216_p7 = scmp.lt.s32.totalorder %s1210_s4, %s1210_s4 }
  0x30   :  { %p1217_p8 = por %p1216_p7, %p1215_p6 }
  0x32   :  { %p1218_p9 = pnand %p1217_p8, %p1211_p5 }
  0x34   :  { %1221 = shalt.err (!%p1218_p9)
}
  0x35   :  { %94 = dma.hbm_to_vmem [thread:$0]  %s1617_s7, 1024, %s89_s15, [#allocation15], %s1344_s21, %s1344_s21, %s1345_s22  }
  0x36   :  { %s1222_s30 = scalar_lea.hbm %s1610_s0, 128 }
  0x37   :  { %p1223_p10 = scmp.ne.s32.totalorder %s1610_s0, %s1222_s30  ;;  %p1226_p11 = scmp.lt.u32.totalorder %s1222_s30, %s1610_s0 }
  0x39   :  { %p1228_p12 = pnand %p1226_p11, %p1223_p10 }
  0x3b   :  { %1231 = shalt.err (!%p1228_p12)
}
  0x3c   :  { %s1232_s14 = scalar_lea.vmem %s1443_s17, 128  ;;  %p1237_p0 = scmp.lt.s32.totalorder %s1443_s17, %s1443_s17 }
  0x3d   :  { %p1233_p13 = scmp.ne.s32.totalorder %s1443_s17, %s1232_s14  ;;  %p1238_p1 = scmp.lt.s32.totalorder %s1232_s14, %s1232_s14 }
  0x3f   :  { %p1239_p2 = por %p1238_p1, %p1237_p0 }
  0x41   :  { %p1240_p3 = pnand %p1239_p2, %p1233_p13 }
  0x43   :  { %1243 = shalt.err (!%p1240_p3)
}
  0x44   :  { %30 = dma.hbm_to_vmem [thread:$0]  %s1610_s0, 128, %s1443_s17, [#allocation6], %s1344_s21, %s1344_s21, %s1345_s22  }
  0x45   :  { %s1348_s16 = smov [#allocation10]   ;;  %s1349_s19 = smov [#allocation13]  }
  0x46   :  { %s50_s18 = sshll.u32 %s1348_s16, 4  ;;  %s74_s20 = sshll.u32 %s1349_s19, 4  ;;  %s51_s18 = int_to_ptr.vmem [resolvable:$true] %s50_s18  ;;  %s1480_s20 = int_to_ptr.vmem [resolvable:$true] %s74_s20 }
  0x47   :  { %s1244_s25 = scalar_lea.hbm %s1613_s3, 1024 }
  0x48   :  { %p1245_p4 = scmp.ne.s32.totalorder %s1613_s3, %s1244_s25  ;;  %p1248_p5 = scmp.lt.u32.totalorder %s1244_s25, %s1613_s3 }
  0x4a   :  { %p1250_p6 = pnand %p1248_p5, %p1245_p4 }
  0x4c   :  { %1253 = shalt.err (!%p1250_p6)
}
  0x4d   :  { %s1254_s0 = scalar_lea.vmem %s51_s18, 1024  ;;  %p1259_p8 = scmp.lt.s32.totalorder %s51_s18, %s51_s18 }
  0x4e   :  { %p1255_p7 = scmp.ne.s32.totalorder %s51_s18, %s1254_s0  ;;  %p1260_p9 = scmp.lt.s32.totalorder %s1254_s0, %s1254_s0 }
  0x50   :  { %p1261_p10 = por %p1260_p9, %p1259_p8 }
  0x52   :  { %p1262_p11 = pnand %p1261_p10, %p1255_p7 }
  0x54   :  { %1265 = shalt.err (!%p1262_p11)
}
  0x55   :  { %56 = dma.hbm_to_vmem [thread:$0]  %s1613_s3, 1024, %s51_s18, [#allocation9], %s1344_s21, %s1344_s21, %s1345_s22  }
  0x56   :  { %s1266_s11 = scalar_lea.hbm %s1615_s5, 1024 }
  0x57   :  { %p1267_p12 = scmp.ne.s32.totalorder %s1615_s5, %s1266_s11  ;;  %p1270_p13 = scmp.lt.u32.totalorder %s1266_s11, %s1615_s5 }
  0x59   :  { %p1272_p0 = pnand %p1270_p13, %p1267_p12 }
  0x5b   :  { %1275 = shalt.err (!%p1272_p0)
}
  0x5c   :  { %s1276_s7 = scalar_lea.vmem %s1480_s20, 1024  ;;  %p1281_p2 = scmp.lt.s32.totalorder %s1480_s20, %s1480_s20 }
  0x5d   :  { %p1277_p1 = scmp.ne.s32.totalorder %s1480_s20, %s1276_s7  ;;  %p1282_p3 = scmp.lt.s32.totalorder %s1276_s7, %s1276_s7 }
  0x5f   :  { %p1283_p4 = por %p1282_p3, %p1281_p2 }
  0x61   :  { %p1284_p5 = pnand %p1283_p4, %p1277_p1 }
  0x63   :  { %1287 = shalt.err (!%p1284_p5)
}
  0x64   :  { %80 = dma.hbm_to_vmem [thread:$0]  %s1615_s5, 1024, %s1480_s20, [#allocation12], %s1344_s21, %s1344_s21, %s1345_s22  }
  0x65   :  { %s1350_s16 = smov [#allocation16]   ;;  %s1288_s24 = scalar_lea.hbm %s1618_s8, 1024 }
  0x66   :  { %s100_s18 = sshll.u32 %s1350_s16, 4  ;;  %p1289_p6 = scmp.ne.s32.totalorder %s1618_s8, %s1288_s24  ;;  %s101_s18 = int_to_ptr.vmem [resolvable:$true] %s100_s18 }
  0x67   :  { %p1292_p7 = scmp.lt.u32.totalorder %s1288_s24, %s1618_s8 }
  0x69   :  { %p1294_p8 = pnand %p1292_p7, %p1289_p6 }
  0x6b   :  { %1297 = shalt.err (!%p1294_p8)
}
  0x6c   :  { %s1298_s27 = scalar_lea.vmem %s101_s18, 1024  ;;  %p1303_p10 = scmp.lt.s32.totalorder %s101_s18, %s101_s18 }
  0x6d   :  { %p1299_p9 = scmp.ne.s32.totalorder %s101_s18, %s1298_s27  ;;  %p1304_p11 = scmp.lt.s32.totalorder %s1298_s27, %s1298_s27 }
  0x6f   :  { %p1305_p12 = por %p1304_p11, %p1303_p10 }
  0x71   :  { %p1306_p13 = pnand %p1305_p12, %p1299_p9 }
  0x73   :  { %1309 = shalt.err (!%p1306_p13)
}
  0x74   :  { %106 = dma.hbm_to_vmem [thread:$0]  %s1618_s8, 1024, %s101_s18, [#allocation15], %s1344_s21, %s1344_s21, %s1345_s22  }
  0x75   :  { %1332 = dma.done.wait [#allocation6], 128  }
  0x76   :  { %1333 = vsyncadd [#allocation6], 4294967168 }
  0x77   :  { %1334 = dma.done.wait [#allocation9], 2048  }
  0x78   :  { %1335 = vsyncadd [#allocation9], 4294965248 }
  0x79   :  { %1336 = dma.done.wait [#allocation12], 2048  }
  0x7a   :  { %1337 = vsyncadd [#allocation12], 4294965248 }
  0x7b   :  { %1338 = dma.done.wait [#allocation15], 2048  }
  0x7c   :  { %1339 = vsyncadd [#allocation15], 4294965248  ;;  %v1351_v0 = vmov 0.0   ;;  %vm1352_vm0 = vmmov 0   ;;  %v1106_v1 = vld [vmem:[#allocation10] sm:$0xff]   ;;  %v1107_v2 = vld [vmem:[#allocation10 + $0x8] sm:$0xff]  }
  0x7d   :  { %966 = vmatprep.subr.bf16.mxu0 %v1351_v0  ;;  %982 = vmatprep.mubr.msk.bf16.mxu0 %vm1352_vm0, %v1351_v0  ;;  %v1108_v3 = vld [vmem:[#allocation10 + $0x10] sm:$0xff]   ;;  %v1109_v4 = vld [vmem:[#allocation10 + $0x18] sm:$0xff]   ;;  %v1116_v5 = vld [vmem:[#allocation11] sm:$0xff]   ;;  %s1353_s0 = smov [#allocation17]  }
  0x7e   :  { %986 = vmatprep.subr.bf16.mxu1 %v1351_v0  ;;  %1002 = vmatprep.mubr.msk.bf16.mxu1 %vm1352_vm0, %v1351_v0  ;;  %v1118_v6 = vld [vmem:[#allocation11 + $0x8] sm:$0xff]   ;;  %v1110_v7 = vld [vmem:[#allocation10 + $0x20] sm:$0xff]   ;;  %v1120_v8 = vld [vmem:[#allocation11 + $0x10] sm:$0xff]   ;;  %s845_s17 = sshll.u32 %s1353_s0, 4  ;;  %s846_s17 = int_to_ptr.vmem [resolvable:$true] %s845_s17 }
  0x7f   :  { %967 = vmatpush3.bf16.msra.mxu0 %v1106_v1  ;;  %987 = vmatpush3.bf16.msra.mxu1 %v1116_v5  ;;  %v1111_v9 = vld [vmem:[#allocation10 + $0x28] sm:$0xff]   ;;  %v1122_v10 = vld [vmem:[#allocation11 + $0x18] sm:$0xff]   ;;  %v1112_v11 = vld [vmem:[#allocation10 + $0x30] sm:$0xff]   ;;  %s1310_s28 = scalar_lea.vmem %s846_s17, 256  ;;  %p1315_p1 = scmp.lt.s32.totalorder %s846_s17, %s846_s17 }
  0x80   :  { %968 = vmatprep.subr.bf16.mxu0 %v1351_v0  ;;  %988 = vmatprep.subr.bf16.mxu1 %v1351_v0  ;;  %v1124_v12 = vld [vmem:[#allocation11 + $0x20] sm:$0xff]   ;;  %v1113_v13 = vld [vmem:[#allocation10 + $0x38] sm:$0xff]   ;;  %v1126_v14 = vld [vmem:[#allocation11 + $0x28] sm:$0xff]   ;;  %p1311_p0 = scmp.ne.s32.totalorder %s846_s17, %s1310_s28  ;;  %p1316_p2 = scmp.lt.s32.totalorder %s1310_s28, %s1310_s28 }
  0x81   :  { %v1114_v15 = vld [vmem:[#allocation5] sm:$0xff]   ;;  %v1115_v16 = vld [vmem:[#allocation8] sm:$0xff]   ;;  %v1128_v17 = vld [vmem:[#allocation11 + $0x30] sm:$0xff]  }
  0x82   :  { %v1117_v18 = vld [vmem:[#allocation8 + $0x8] sm:$0xff]   ;;  %v1119_v19 = vld [vmem:[#allocation8 + $0x10] sm:$0xff]   ;;  %v1121_v20 = vld [vmem:[#allocation8 + $0x18] sm:$0xff]   ;;  %p1317_p3 = por %p1316_p2, %p1315_p1 }
  0x83   :  { %969 = vmatpush3.bf16.msra.mxu0 %v1107_v2  ;;  %989 = vmatpush3.bf16.msra.mxu1 %v1118_v6  ;;  %v1123_v21 = vld [vmem:[#allocation8 + $0x20] sm:$0xff]   ;;  %v1125_v22 = vld [vmem:[#allocation8 + $0x28] sm:$0xff]   ;;  %v1127_v23 = vld [vmem:[#allocation8 + $0x30] sm:$0xff]  }
  0x84   :  { %970 = vmatprep.subr.bf16.mxu0 %v1351_v0  ;;  %990 = vmatprep.subr.bf16.mxu1 %v1351_v0  ;;  %v1129_v24 = vld [vmem:[#allocation8 + $0x38] sm:$0xff]   ;;  %v1133_v27 = vld [vmem:[#allocation14] sm:$0xff]   ;;  %v1135_v28 = vld [vmem:[#allocation14 + $0x8] sm:$0xff]   ;;  %p1318_p4 = pnand %p1317_p3, %p1311_p0 }
  0x85   :  { %v1130_v25 = vld [vmem:[#allocation11 + $0x38] sm:$0xff]   ;;  %v1137_v29 = vld [vmem:[#allocation14 + $0x10] sm:$0xff]   ;;  %v1141_v31 = vld [vmem:[#allocation14 + $0x20] sm:$0xff]  }
  0x86   :  { %v1131_v26 = vld [vmem:[#allocation5] sm:$0xff]   ;;  %v1132_v35 = vld [vmem:[#allocation13] sm:$0xff]   ;;  %v1134_v38 = vld [vmem:[#allocation13 + $0x8] sm:$0xff]  }
  0x87   :  { %971 = vmatpush3.bf16.msra.mxu0 %v1108_v3  ;;  %991 = vmatpush3.bf16.msra.mxu1 %v1120_v8  ;;  %v1139_v30 = vld [vmem:[#allocation14 + $0x18] sm:$0xff]   ;;  %v1136_v39 = vld [vmem:[#allocation13 + $0x10] sm:$0xff]   ;;  %v1140_v41 = vld [vmem:[#allocation13 + $0x20] sm:$0xff]  }
  0x88   :  { %972 = vmatprep.subr.bf16.mxu0 %v1351_v0  ;;  %992 = vmatprep.subr.bf16.mxu1 %v1351_v0  ;;  %v1138_v40 = vld [vmem:[#allocation13 + $0x18] sm:$0xff]   ;;  %v1142_v44 = vld [vmem:[#allocation13 + $0x28] sm:$0xff]   ;;  %v1144_v48 = vld [vmem:[#allocation13 + $0x30] sm:$0xff]  }
  0x89   :  { %v1143_v45 = vld [vmem:[#allocation14 + $0x28] sm:$0xff]   ;;  %v1145_v49 = vld [vmem:[#allocation14 + $0x30] sm:$0xff]   ;;  %v1146_v50 = vld [vmem:[#allocation13 + $0x38] sm:$0xff]  }
  0x8a   :  { %v1147_v51 = vld [vmem:[#allocation14 + $0x38] sm:$0xff]   ;;  %v1148_v63 = vld [vmem:[#allocation16] sm:$0xff]   ;;  %v1149_v2 = vld [vmem:[#allocation16 + $0x8] sm:$0xff]  }
  0x8b   :  { %973 = vmatpush3.bf16.msra.mxu0 %v1109_v4  ;;  %993 = vmatpush3.bf16.msra.mxu1 %v1122_v10  ;;  %v886_v53 = vld [vmem:[%s1612_s2] ss:$0 sm:$0xff]  ;;  %v1150_v3 = vld [vmem:[#allocation16 + $0x10] sm:$0xff]   ;;  %v1152_v5 = vld [vmem:[#allocation16 + $0x20] sm:$0xff]  }
  0x8c   :  { %974 = vmatprep.subr.bf16.mxu0 %v1351_v0  ;;  %994 = vmatprep.subr.bf16.mxu1 %v1351_v0  ;;  %v1151_v4 = vld [vmem:[#allocation16 + $0x18] sm:$0xff]   ;;  %v1153_v6 = vld [vmem:[#allocation16 + $0x28] sm:$0xff]  }
  0x8d   :  { %v1155_v8 = vld [vmem:[#allocation16 + $0x38] sm:$0xff]  }
  0x8f   :  { %975 = vmatpush3.bf16.msra.mxu0 %v1110_v7  ;;  %995 = vmatpush3.bf16.msra.mxu1 %v1124_v12  ;;  %v1154_v7 = vld [vmem:[#allocation16 + $0x30] sm:$0xff]  }
  0x90   :  { %976 = vmatprep.subr.bf16.mxu0 %v1351_v0  ;;  %996 = vmatprep.subr.bf16.mxu1 %v1351_v0 }
  0x93   :  { %977 = vmatpush3.bf16.msra.mxu0 %v1111_v9  ;;  %997 = vmatpush3.bf16.msra.mxu1 %v1126_v14  ;;  %v903_v14 = vld [vmem:[%s1616_s6] ss:$0 sm:$0xff] }
  0x94   :  { %978 = vmatprep.subr.bf16.mxu0 %v1351_v0  ;;  %998 = vmatprep.subr.bf16.mxu1 %v1351_v0 }
  0x97   :  { %979 = vmatpush3.bf16.msra.mxu0 %v1112_v11  ;;  %999 = vmatpush3.bf16.msra.mxu1 %v1128_v17 }
  0x98   :  { %980 = vmatprep.subr.bf16.mxu0 %v1351_v0  ;;  %1000 = vmatprep.subr.bf16.mxu1 %v1351_v0 }
  0x9b   :  { %981 = vmatpush3.bf16.msra.mxu0 %v1113_v13  ;;  %1001 = vmatpush3.bf16.msra.mxu1 %v1130_v25 }
  0x9c   :  { %1006 = vmatprep.subr.bf16.mxu0 %v1351_v0  ;;  %1026 = vmatprep.subr.bf16.mxu1 %v1351_v0 }
  0x9e   :  { %983 = vmatmul.mubr.bf16.vlgmr.msra.gmra.mrb[0].mxu0 %v1114_v15 }
  0x9f   :  { %1007 = vmatpush3.bf16.msra.mxu0 %v1115_v16  ;;  %1022 = vmatprep.mubr.msk.bf16.mxu0 %vm1352_vm0, %v1351_v0 }
  0xa0   :  { %1008 = vmatprep.subr.bf16.mxu0 %v1351_v0 }
  0xa3   :  { %1009 = vmatpush3.bf16.msra.mxu0 %v1117_v18 }
  0xa4   :  { %1010 = vmatprep.subr.bf16.mxu0 %v1351_v0 }
  0xa7   :  { %1011 = vmatpush3.bf16.msra.mxu0 %v1119_v19 }
  0xa8   :  { %1012 = vmatprep.subr.bf16.mxu0 %v1351_v0 }
  0xab   :  { %1013 = vmatpush3.bf16.msra.mxu0 %v1121_v20 }
  0xac   :  { %1014 = vmatprep.subr.bf16.mxu0 %v1351_v0 }
  0xaf   :  { %1015 = vmatpush3.bf16.msra.mxu0 %v1123_v21 }
  0xb0   :  { %1016 = vmatprep.subr.bf16.mxu0 %v1351_v0 }
  0xb3   :  { %1017 = vmatpush3.bf16.msra.mxu0 %v1125_v22 }
  0xb4   :  { %1018 = vmatprep.subr.bf16.mxu0 %v1351_v0 }
  0xb7   :  { %1019 = vmatpush3.bf16.msra.mxu0 %v1127_v23 }
  0xb8   :  { %1020 = vmatprep.subr.bf16.mxu0 %v1351_v0 }
  0xbb   :  { %1021 = vmatpush3.bf16.msra.mxu0 %v1129_v24 }
  0xbc   :  { %1046 = vmatprep.subr.bf16.mxu0 %v1351_v0 }
  0xbe   :  { %1023 = vmatmul.mubr.bf16.vlgmr.msra.gmra.mrb[4].mxu0 %v1131_v26 }
  0xbf   :  { %1062 = vmatprep.mubr.msk.bf16.mxu0 %vm1352_vm0, %v1351_v0  ;;  %1047 = vmatpush3.bf16.msra.mxu0 %v1133_v27 }
  0xc0   :  { %1048 = vmatprep.subr.bf16.mxu0 %v1351_v0 }
  0xc3   :  { %1049 = vmatpush3.bf16.msra.mxu0 %v1135_v28 }
  0xc4   :  { %1050 = vmatprep.subr.bf16.mxu0 %v1351_v0 }
  0xc7   :  { %1051 = vmatpush3.bf16.msra.mxu0 %v1137_v29 }
  0xc8   :  { %1052 = vmatprep.subr.bf16.mxu0 %v1351_v0 }
  0xcb   :  { %1053 = vmatpush3.bf16.msra.mxu0 %v1139_v30 }
  0xcc   :  { %1054 = vmatprep.subr.bf16.mxu0 %v1351_v0 }
  0xcf   :  { %1055 = vmatpush3.bf16.msra.mxu0 %v1141_v31 }
  0xd0   :  { %1056 = vmatprep.subr.bf16.mxu0 %v1351_v0 }
  0xd3   :  { %1057 = vmatpush3.bf16.msra.mxu0 %v1143_v45 }
  0xd4   :  { %1058 = vmatprep.subr.bf16.mxu0 %v1351_v0 }
  0xd7   :  { %1059 = vmatpush3.bf16.msra.mxu0 %v1145_v49 }
  0xd8   :  { %1060 = vmatprep.subr.bf16.mxu0 %v1351_v0 }
  0xdb   :  { %1061 = vmatpush3.bf16.msra.mxu0 %v1147_v51 }
 0x171   :  { %v239_v32 = vpop.f32.mrb[0].mxu0 }
 0x172   :  { %v984_v33 = vpop.f32.mrb[1].mxu0 }
 0x173   :  { %v242_v34 = vpop.f32.mrb[2].mxu0 }
 0x174   :  { %v268_v36 = vpack.c.bf16 %v242_v34, %v239_v32  ;;  %v985_v37 = vpop.f32.mrb[3].mxu0 }
 0x176   :  { %1003 = vmatmul.mubr.bf16.vlgmr.msra.gmra.mrb[0].mxu1 %v268_v36 }
 0x177   :  { %1027 = vmatpush3.bf16.msra.mxu1 %v1132_v35  ;;  %1042 = vmatprep.mubr.msk.bf16.mxu1 %vm1352_vm0, %v1351_v0 }
 0x178   :  { %1028 = vmatprep.subr.bf16.mxu1 %v1351_v0 }
 0x17b   :  { %1029 = vmatpush3.bf16.msra.mxu1 %v1134_v38 }
 0x17c   :  { %1030 = vmatprep.subr.bf16.mxu1 %v1351_v0 }
 0x17f   :  { %1031 = vmatpush3.bf16.msra.mxu1 %v1136_v39 }
 0x180   :  { %1032 = vmatprep.subr.bf16.mxu1 %v1351_v0 }
 0x183   :  { %1033 = vmatpush3.bf16.msra.mxu1 %v1138_v40 }
 0x184   :  { %1034 = vmatprep.subr.bf16.mxu1 %v1351_v0 }
 0x187   :  { %1035 = vmatpush3.bf16.msra.mxu1 %v1140_v41 }
 0x188   :  { %1036 = vmatprep.subr.bf16.mxu1 %v1351_v0 }
 0x18b   :  { %1037 = vmatpush3.bf16.msra.mxu1 %v1142_v44 }
 0x18c   :  { %1038 = vmatprep.subr.bf16.mxu1 %v1351_v0 }
 0x18f   :  { %1039 = vmatpush3.bf16.msra.mxu1 %v1144_v48 }
 0x190   :  { %1040 = vmatprep.subr.bf16.mxu1 %v1351_v0 }
 0x191   :  { %v462_v42 = vpop.f32.mrb[4].mxu0 }
 0x192   :  { %v1024_v43 = vpop.f32.mrb[5].mxu0 }
 0x193   :  { %v465_v46 = vpop.f32.mrb[6].mxu0  ;;  %1041 = vmatpush3.bf16.msra.mxu1 %v1146_v50 }
 0x194   :  { %v1025_v47 = vpop.f32.mrb[7].mxu0  ;;  %1066 = vmatprep.subr.bf16.mxu1 %v1351_v0 }
 0x249   :  { %v367_v52 = vpop.f32.mrb[0].mxu1 }
 0x24a   :  { %v463_v54 = vadd.f32 %v462_v42, %v367_v52  ;;  %v1004_v55 = vpop.f32.mrb[1].mxu1 }
 0x24b   :  { %v370_v56 = vpop.f32.mrb[2].mxu1 }
 0x24c   :  { %v476_v57 = vadd.f32 %v886_v53, %v463_v54  ;;  %v466_v58 = vadd.f32 %v465_v46, %v370_v56  ;;  %v1005_v59 = vpop.f32.mrb[3].mxu1 }
 0x24e   :  { %v477_v60 = vadd.f32 %v886_v53, %v466_v58  ;;  %v478_v61 = vmax.f32 %v476_v57, 0.0 }
 0x250   :  { %v479_v62 = vmax.f32 %v477_v60, 0.0 }
 0x252   :  { %v480_v1 = vpack.c.bf16 %v479_v62, %v478_v61 }
 0x254   :  { %1043 = vmatmul.mubr.bf16.vlgmr.msra.gmra.mrb[4].mxu1 %v480_v1  ;;  %1063 = vmatmul.mubr.bf16.vlgmr.msra.gmra.mrb[8].mxu0 %v480_v1 }
 0x255   :  { %1067 = vmatpush3.bf16.msra.mxu1 %v1148_v63  ;;  %1082 = vmatprep.mubr.msk.bf16.mxu1 %vm1352_vm0, %v1351_v0 }
 0x256   :  { %1068 = vmatprep.subr.bf16.mxu1 %v1351_v0 }
 0x259   :  { %1069 = vmatpush3.bf16.msra.mxu1 %v1149_v2 }
 0x25a   :  { %1070 = vmatprep.subr.bf16.mxu1 %v1351_v0 }
 0x25d   :  { %1071 = vmatpush3.bf16.msra.mxu1 %v1150_v3 }
 0x25e   :  { %1072 = vmatprep.subr.bf16.mxu1 %v1351_v0 }
 0x261   :  { %1073 = vmatpush3.bf16.msra.mxu1 %v1151_v4 }
 0x262   :  { %1074 = vmatprep.subr.bf16.mxu1 %v1351_v0 }
 0x265   :  { %1075 = vmatpush3.bf16.msra.mxu1 %v1152_v5 }
 0x266   :  { %1076 = vmatprep.subr.bf16.mxu1 %v1351_v0 }
 0x269   :  { %1077 = vmatpush3.bf16.msra.mxu1 %v1153_v6 }
 0x26a   :  { %1078 = vmatprep.subr.bf16.mxu1 %v1351_v0 }
 0x26d   :  { %1079 = vmatpush3.bf16.msra.mxu1 %v1154_v7 }
 0x26e   :  { %1080 = vmatprep.subr.bf16.mxu1 %v1351_v0 }
 0x271   :  { %1081 = vmatpush3.bf16.msra.mxu1 %v1155_v8 }
 0x327   :  { %v684_v9 = vpop.f32.mrb[8].mxu0 }
 0x328   :  { %v1064_v10 = vpop.f32.mrb[9].mxu0 }
 0x329   :  { %v687_v11 = vpop.f32.mrb[10].mxu0 }
 0x32a   :  { %v730_v12 = vpack.c.bf16 %v687_v11, %v684_v9  ;;  %v1065_v13 = vpop.f32.mrb[11].mxu0 }
 0x32c   :  { %1083 = vmatmul.mubr.bf16.vlgmr.msra.gmra.mrb[4].mxu1 %v730_v12 }
 0x3ff   :  { %v829_v15 = vpop.f32.mrb[4].mxu1 }
 0x400   :  { %v1086_v16 = vadd.f32 %v903_v14, %v829_v15  ;;  %v1084_v17 = vpop.f32.mrb[5].mxu1 }
 0x401   :  { %v832_v18 = vpop.f32.mrb[6].mxu1 }
 0x402   :  { %838 = vst [vmem:[#allocation17] sm:$0xff] %v1086_v16  ;;  %v1087_v0 = vadd.f32 %v903_v14, %v832_v18  ;;  %v1085_v19 = vpop.f32.mrb[7].mxu1 }
 0x404   :  { %839 = vst [vmem:[#allocation17 + $0x8] sm:$0xff] %v1087_v0 }
 0x405   :  { %1321 = shalt.err (!%p1318_p4)
}
 0x406   :  { %s1322_s30 = scalar_lea.hbm %s1619_s9, 256 }
 0x407   :  { %p1323_p5 = scmp.ne.s32.totalorder %s1619_s9, %s1322_s30  ;;  %p1326_p6 = scmp.lt.u32.totalorder %s1322_s30, %s1619_s9 }
 0x409   :  { %p1328_p7 = pnand %p1326_p6, %p1323_p5 }
 0x40b   :  { %1331 = shalt.err (!%p1328_p7)
}
 0x40c   :  { %s1354_s14 = smov 128   ;;  %s1355_s7 = smov 8  }
 0x40d   :  { %851 = dma.vmem_to_hbm [thread:$0]  %s846_s17, 256, %s1619_s9, [#allocation7], %s1354_s14, %s1354_s14, %s1355_s7  }
 0x40e   :  { %1340 = dma.done.wait [#allocation7], 256  }
 0x40f   :  { %1341 = vsyncadd [#allocation7], 4294967040 }
 0x410   :  { %855 = vsyncpa [#allocation6], 1 }
 0x411   :  { %856 = vsyncpa [#allocation9], 1 }
 0x412   :  { %857 = vsyncpa [#allocation12], 1 }
 0x413   :  { %858 = vsyncpa [#allocation15], 1 }
 0x414   :  { %859 = vsyncpa [#allocation7], 1 }

</bundles_post_ra>
